<compile_context>
chip_gen: v6e
topology: v6e:2x2x1
jax: 0.10.0
libtpu: 0.0.40
codegen_flags: <defaults>
</compile_context>

<pallas_src>
import math
import functools

import jax
import jax.numpy as jnp
from jax import lax
from jax.experimental import pallas as pl
from jax.experimental.pallas import tpu as pltpu


def _attention_kernel(*refs, scale, has_mask, store_weights):
    """One (batch, q-tile) per grid step.

    Ref order (positional, depending on static flags):
      [vl_ref]  SMEM (B,) int32     valid lengths (only when has_mask)
      q_ref     VMEM (1, TQ, d)
      k_ref     VMEM (1, Tk, d)
      v_ref     VMEM (1, Tk, dv)
      o_ref     VMEM (1, TQ, dv)    attention output
      [w_ref]   VMEM (1, TQ, Tk)    attention weights (only when store_weights)
    """
    idx = 0
    vl_ref = None
    if has_mask:
        vl_ref = refs[0]
        idx = 1
    q_ref, k_ref, v_ref, o_ref = refs[idx:idx + 4]
    w_ref = refs[idx + 4] if store_weights else None

    b = pl.program_id(0)

    q = q_ref[0]                               # (TQ, d), native dtype
    k = k_ref[0]                               # (Tk, d)
    v = v_ref[0]                               # (Tk, dv)

    fold_scale_into_q = (q.dtype == jnp.float32)
    if fold_scale_into_q:
        # Cheaper: Tq*d multiplies instead of Tq*Tk, exact in f32.
        q = q * jnp.asarray(scale, q.dtype)

    # scores = Q @ K^T without materializing the transpose: contract dim 1 of
    # both operands directly on the MXU, f32 accumulate (bf16 fast path kept).
    scores = lax.dot_general(
        q, k,
        dimension_numbers=(((1,), (1,)), ((), ())),
        preferred_element_type=jnp.float32)    # (TQ, Tk) f32

    if not fold_scale_into_q:
        # Apply the scale in f32 so low-precision inputs don't round it early.
        scores = scores * jnp.float32(scale)

    if has_mask:
        # masked_softmax: columns j >= valid_lens[b] get -1e6 before softmax
        # (exactly reproduces X[~mask] = -1000000.0 in the reference).
        vl = vl_ref[b]
        col = lax.broadcasted_iota(jnp.int32, scores.shape, 1)
        scores = jnp.where(col < vl, scores, jnp.float32(-1000000.0))

    # Numerically stable softmax along the last axis (VPU/EUP).
    # approx=False keeps softmax rows summing to 1 so weights match the
    # reference to 1e-4.
    m = jnp.max(scores, axis=-1, keepdims=True)
    e = jnp.exp(scores - m)
    s = jnp.sum(e, axis=-1, keepdims=True)
    weights_f32 = e * pl.reciprocal(s, approx=False)

    # Single low-precision materialization of the (TQ, Tk) weights, reused for
    # both the writeback and (when dtypes match) the PV matmul.
    out_dtype = w_ref.dtype if store_weights else v.dtype
    w_lo = weights_f32.astype(out_dtype)
    if store_weights:
        w_ref[0] = w_lo

    w_pv = w_lo if w_lo.dtype == v.dtype else weights_f32.astype(v.dtype)

    # dropout(weights) @ V  -- eval-mode dropout == identity.
    o = jnp.dot(w_pv, v, preferred_element_type=jnp.float32)
    o_ref[0] = o.astype(o_ref.dtype)


def _pick_q_tile(Tq):
    """Largest q-tile <= 256 that divides Tq (multiple of 16 so bf16 blocks sit
    on the native (16,128) packing; bounds the (TQ,Tk) scores/e/weights
    working set)."""
    for cand in (256, 128, 64, 32, 16):
        if Tq % cand == 0:
            return cand
    return Tq


def _vmem_ceiling_bytes():
    """~3/4 of physical VMEM for this generation (96 MiB on v5e/v6e's 128 MiB,
    48 MiB on v7x's 64 MiB); conservative fallback if the query fails."""
    try:
        info = pltpu.get_tpu_info()
        cap = getattr(info, "vmem_capacity_bytes", None)
        if cap:
            return int(cap) * 3 // 4
    except Exception:
        pass
    return 48 << 20


@functools.partial(jax.jit, static_argnames=("return_weights",))
def dot_product_attention(Q, K, V, valid_lens=None, *, return_weights=True):
    """Pallas implementation of DotProductAttention.forward (eval mode).

    Returns (output, attention_weights) if return_weights else output.

    NOTE: only 1-D valid_lens of shape (B,) is supported — the reference
    module's masked_softmax also only handles that shape (and assumes Tq==Tk).
    """
    B, Tq, d = Q.shape
    _, Tk, _ = K.shape
    dv = V.shape[-1]

    has_mask = valid_lens is not None
    if has_mask:
        valid_lens = valid_lens.astype(jnp.int32)

    TQ = _pick_q_tile(Tq)
    n_q_tiles = Tq // TQ

    # index_maps take (*grid_idx, *prefetch_refs); *_ absorbs the optional
    # scalar-prefetch ref so the same lambdas work for both variants.
    in_specs = [
        pl.BlockSpec((1, TQ, d), lambda b, i, *_: (b, i, 0)),
        pl.BlockSpec((1, Tk, d), lambda b, i, *_: (b, 0, 0)),
        pl.BlockSpec((1, Tk, dv), lambda b, i, *_: (b, 0, 0)),
    ]
    o_spec = pl.BlockSpec((1, TQ, dv), lambda b, i, *_: (b, i, 0))
    if return_weights:
        out_specs = [o_spec, pl.BlockSpec((1, TQ, Tk), lambda b, i, *_: (b, i, 0))]
        out_shape = (
            jax.ShapeDtypeStruct((B, Tq, dv), Q.dtype),
            # torch keeps weights in the input dtype; also halves HBM
            # writeback for bf16 inputs.
            jax.ShapeDtypeStruct((B, Tq, Tk), Q.dtype),
        )
    else:
        out_specs = o_spec
        out_shape = jax.ShapeDtypeStruct((B, Tq, dv), Q.dtype)

    grid_spec = pltpu.PrefetchScalarGridSpec(
        num_scalar_prefetch=1 if has_mask else 0,
        grid=(B, n_q_tiles),
        in_specs=in_specs,
        out_specs=out_specs,
    )

    # VMEM budget: 2x (double-buffer) per input/output block at real dtypes,
    # plus ~3x TQ*Tk f32 intermediates (scores, e, f32 weights) and headroom.
    q_it = jnp.dtype(Q.dtype).itemsize
    k_it = jnp.dtype(K.dtype).itemsize
    v_it = jnp.dtype(V.dtype).itemsize
    in_block = TQ * d * q_it + Tk * d * k_it + Tk * dv * v_it
    out_block = TQ * dv * q_it + (TQ * Tk * q_it if return_weights else 0)
    f32_scratch = 3 * TQ * Tk * 4
    need = 2 * (in_block + out_block) + f32_scratch + (2 << 20)
    vmem_bytes = int(min(max(need, 16 << 20), _vmem_ceiling_bytes()))

    kernel = functools.partial(
        _attention_kernel,
        scale=1.0 / math.sqrt(d),
        has_mask=has_mask,
        store_weights=return_weights,
    )

    call = pl.pallas_call(
        kernel,
        grid_spec=grid_spec,
        out_shape=out_shape,
        compiler_params=pltpu.CompilerParams(
            dimension_semantics=("parallel", "parallel"),
            vmem_limit_bytes=vmem_bytes,
        ),
    )

    if has_mask:
        results = call(valid_lens, Q, K, V)
    else:
        results = call(Q, K, V)

    if return_weights:
        out, weights = results
        return out, weights
    return results


def _reference(Q, K, V, valid_lens=None):
    """Plain-JAX reference mirroring the PyTorch forward (eval mode)."""
    d = Q.shape[-1]
    scores = jnp.einsum("bqd,bkd->bqk", Q, K) / math.sqrt(d)
    if valid_lens is not None:
        col = jnp.arange(scores.shape[-1])[None, None, :]
        mask = col < valid_lens[:, None, None]
        scores = jnp.where(mask, scores, -1000000.0)
    w = jax.nn.softmax(scores, axis=-1)
    return jnp.einsum("bqk,bkv->bqv", w, V), w


if __name__ == "__main__":
    key = jax.random.PRNGKey(0)
    kq, kk, kv = jax.random.split(key, 3)

    # Small shapes consistent with the module's self-attention usage.
    B, Tq, Tk, d, dv = 2, 8, 8, 32, 32
    Q = jax.random.normal(kq, (B, Tq, d), dtype=jnp.float32)
    K = jax.random.normal(kk, (B, Tk, d), dtype=jnp.float32)
    V = jax.random.normal(kv, (B, Tk, dv), dtype=jnp.float32)
    valid_lens = jnp.array([3, 6], dtype=jnp.int32)

    out, weights = dot_product_attention(Q, K, V, valid_lens)
    jax.block_until_ready(out)
    jax.block_until_ready(weights)

    ref_out, ref_w = _reference(Q, K, V, valid_lens)
    assert jnp.allclose(out, ref_out, atol=1e-4, rtol=1e-4), "output mismatch"
    assert jnp.allclose(weights, ref_w, atol=1e-4, rtol=1e-4), "weights mismatch"

    # Unmasked (valid_lens=None) specialized path.
    out2, _ = dot_product_attention(Q, K, V, None)
    jax.block_until_ready(out2)
    ref_out2, _ = _reference(Q, K, V, None)
    assert jnp.allclose(out2, ref_out2, atol=1e-4, rtol=1e-4), "unmasked mismatch"

    # weights-free path (drops the weights writeback entirely).
    out3 = dot_product_attention(Q, K, V, valid_lens, return_weights=False)
    jax.block_until_ready(out3)
    assert jnp.allclose(out3, ref_out, atol=1e-4, rtol=1e-4), "no-weights mismatch"

    # Larger config to exercise the multi-q-tile path (TQ=256, multiple tiles).
    B2, Tq2, Tk2, d2, dv2 = 2, 512, 128, 64, 64
    kq2, kk2, kv2 = jax.random.split(jax.random.PRNGKey(1), 3)
    Q2 = jax.random.normal(kq2, (B2, Tq2, d2), dtype=jnp.float32)
    K2 = jax.random.normal(kk2, (B2, Tk2, d2), dtype=jnp.float32)
    V2 = jax.random.normal(kv2, (B2, Tk2, dv2), dtype=jnp.float32)
    vl2 = jnp.array([100, 37], dtype=jnp.int32)
    out4, w4 = dot_product_attention(Q2, K2, V2, vl2)
    jax.block_until_ready(out4)
    ref_out4, ref_w4 = _reference(Q2, K2, V2, vl2)
    assert jnp.allclose(out4, ref_out4, atol=1e-3, rtol=1e-3), "tiled output mismatch"
    assert jnp.allclose(w4, ref_w4, atol=1e-4, rtol=1e-4), "tiled weights mismatch"

    print("KERNEL_OK")
</pallas_src>

<mosaic_0001>
module attributes {stable_mosaic.version = 11 : i64} {
  func.func @_attention_kernel(%arg0: i32, %arg1: i32, %arg2: memref<2xi32, #tpu.memory_space<smem>>, %arg3: memref<1x8x32xf32, #tpu.memory_space<vmem>>, %arg4: memref<1x8x32xf32, #tpu.memory_space<vmem>>, %arg5: memref<1x8x32xf32, #tpu.memory_space<vmem>>, %arg6: memref<1x8x32xf32, #tpu.memory_space<vmem>>, %arg7: memref<1x8x8xf32, #tpu.memory_space<vmem>>) attributes {dimension_semantics = [#tpu.dimension_semantics<parallel>, #tpu.dimension_semantics<parallel>], iteration_bounds = array<i64: 2, 1>, scalar_prefetch = 1 : i64, scratch_operands = 0 : i64, tpu.core_type = #tpu.core_type<tc>, window_params = [{transform_indices = @transform_0, window_bounds = array<i64: 1, 8, 32>}, {transform_indices = @transform_1, window_bounds = array<i64: 1, 8, 32>}, {transform_indices = @transform_2, window_bounds = array<i64: 1, 8, 32>}, {transform_indices = @transform_3, window_bounds = array<i64: 1, 8, 32>}, {transform_indices = @transform_4, window_bounds = array<i64: 1, 8, 8>}]} {
    %c0 = arith.constant 0 : index
    %c0_0 = arith.constant 0 : index
    %c0_1 = arith.constant 0 : index
    %0 = vector.load %arg3[%c0, %c0_0, %c0_1] : memref<1x8x32xf32, #tpu.memory_space<vmem>>, vector<1x8x32xf32>
    %1 = vector.shape_cast %0 : vector<1x8x32xf32> to vector<8x32xf32>
    %c0_2 = arith.constant 0 : index
    %c0_3 = arith.constant 0 : index
    %c0_4 = arith.constant 0 : index
    %2 = vector.load %arg4[%c0_2, %c0_3, %c0_4] : memref<1x8x32xf32, #tpu.memory_space<vmem>>, vector<1x8x32xf32>
    %3 = vector.shape_cast %2 : vector<1x8x32xf32> to vector<8x32xf32>
    %c0_5 = arith.constant 0 : index
    %c0_6 = arith.constant 0 : index
    %c0_7 = arith.constant 0 : index
    %4 = vector.load %arg5[%c0_5, %c0_6, %c0_7] : memref<1x8x32xf32, #tpu.memory_space<vmem>>, vector<1x8x32xf32>
    %5 = vector.shape_cast %4 : vector<1x8x32xf32> to vector<8x32xf32>
    %cst = arith.constant 0.176776692 : f32
    %6 = vector.broadcast %cst : f32 to vector<8x32xf32>
    %7 = arith.mulf %1, %6 : vector<8x32xf32>
    %cst_8 = arith.constant dense<0.000000e+00> : vector<8x8xf32>
    %8 = tpu.matmul %7, %3, %cst_8 {dimension_numbers = #tpu.dot_dimension_numbers<[1], [1], [0], [0], [0, 0, 1, 0], [], []>} : vector<8x32xf32>, vector<8x32xf32>, vector<8x8xf32> -> vector<8x8xf32>
    %9 = arith.index_cast %arg0 : i32 to index
    %10 = memref.load %arg2[%9] : memref<2xi32, #tpu.memory_space<smem>>
    %11 = tpu.iota {dimensions = array<i32: 1>} : vector<8x8xi32>
    %12 = vector.broadcast %10 : i32 to vector<8x8xi32>
    %13 = arith.cmpi slt, %11, %12 : vector<8x8xi32>
    %cst_9 = arith.constant -1.000000e+06 : f32
    %14 = vector.broadcast %cst_9 : f32 to vector<8x8xf32>
    %15 = arith.select %13, %8, %14 : vector<8x8xi1>, vector<8x8xf32>
    %cst_10 = arith.constant dense<0xFF800000> : vector<8xf32>
    %16 = vector.multi_reduction <maximumf>, %15, %cst_10 [1] : vector<8x8xf32> to vector<8xf32>
    %17 = vector.shape_cast %16 : vector<8xf32> to vector<8x1xf32>
    %18 = vector.broadcast %17 : vector<8x1xf32> to vector<8x8xf32>
    %19 = arith.subf %15, %18 : vector<8x8xf32>
    %20 = math.exp %19 : vector<8x8xf32>
    %cst_11 = arith.constant dense<0.000000e+00> : vector<8xf32>
    %21 = vector.multi_reduction <add>, %20, %cst_11 [1] : vector<8x8xf32> to vector<8xf32>
    %22 = vector.shape_cast %21 : vector<8xf32> to vector<8x1xf32>
    %23 = tpu.reciprocal %22 : vector<8x1xf32> -> vector<8x1xf32>
    %24 = vector.broadcast %23 : vector<8x1xf32> to vector<8x8xf32>
    %25 = arith.mulf %20, %24 : vector<8x8xf32>
    %c0_12 = arith.constant 0 : index
    %c0_13 = arith.constant 0 : index
    %c0_14 = arith.constant 0 : index
    %26 = vector.load %arg7[%c0_12, %c0_13, %c0_14] : memref<1x8x8xf32, #tpu.memory_space<vmem>>, vector<1x8x8xf32>
    %27 = vector.shape_cast %26 : vector<1x8x8xf32> to vector<8x8xf32>
    %28 = vector.shape_cast %25 : vector<8x8xf32> to vector<1x8x8xf32>
    tpu.vector_store %arg7[%c0_12, %c0_13, %c0_14], %28 {strides = array<i32>} : memref<1x8x8xf32, #tpu.memory_space<vmem>>, vector<1x8x8xf32>,
    %cst_15 = arith.constant dense<0.000000e+00> : vector<8x32xf32>
    %29 = tpu.matmul %25, %5, %cst_15 {dimension_numbers = #tpu.dot_dimension_numbers<[1], [0], [0], [1], [0, 0, 1, 1], [], []>} : vector<8x8xf32>, vector<8x32xf32>, vector<8x32xf32> -> vector<8x32xf32>
    %c0_16 = arith.constant 0 : index
    %c0_17 = arith.constant 0 : index
    %c0_18 = arith.constant 0 : index
    %30 = vector.load %arg6[%c0_16, %c0_17, %c0_18] : memref<1x8x32xf32, #tpu.memory_space<vmem>>, vector<1x8x32xf32>
    %31 = vector.shape_cast %30 : vector<1x8x32xf32> to vector<8x32xf32>
    %32 = vector.shape_cast %29 : vector<8x32xf32> to vector<1x8x32xf32>
    tpu.vector_store %arg6[%c0_16, %c0_17, %c0_18], %32 {strides = array<i32>} : memref<1x8x32xf32, #tpu.memory_space<vmem>>, vector<1x8x32xf32>,
    return
  }
  func.func @transform_0(%arg0: i32, %arg1: i32, %arg2: memref<2xi32, #tpu.memory_space<smem>>) -> (i32, i32, i32) {
    %c0_i32 = arith.constant 0 : i32
    %c0_i32_0 = arith.constant 0 : i32
    return %arg0, %arg1, %c0_i32 : i32, i32, i32
  }
  func.func @transform_1(%arg0: i32, %arg1: i32, %arg2: memref<2xi32, #tpu.memory_space<smem>>) -> (i32, i32, i32) {
    %c0_i32 = arith.constant 0 : i32
    %c0_i32_0 = arith.constant 0 : i32
    %c0_i32_1 = arith.constant 0 : i32
    return %arg0, %c0_i32, %c0_i32_0 : i32, i32, i32
  }
  func.func @transform_2(%arg0: i32, %arg1: i32, %arg2: memref<2xi32, #tpu.memory_space<smem>>) -> (i32, i32, i32) {
    %c0_i32 = arith.constant 0 : i32
    %c0_i32_0 = arith.constant 0 : i32
    %c0_i32_1 = arith.constant 0 : i32
    return %arg0, %c0_i32, %c0_i32_0 : i32, i32, i32
  }
  func.func @transform_3(%arg0: i32, %arg1: i32, %arg2: memref<2xi32, #tpu.memory_space<smem>>) -> (i32, i32, i32) {
    %c0_i32 = arith.constant 0 : i32
    %c0_i32_0 = arith.constant 0 : i32
    return %arg0, %arg1, %c0_i32 : i32, i32, i32
  }
  func.func @transform_4(%arg0: i32, %arg1: i32, %arg2: memref<2xi32, #tpu.memory_space<smem>>) -> (i32, i32, i32) {
    %c0_i32 = arith.constant 0 : i32
    %c0_i32_0 = arith.constant 0 : i32
    return %arg0, %arg1, %c0_i32 : i32, i32, i32
  }
}

</mosaic_0001>

<bundles_post_ra>
// kernel: dot_product_attention.1
= control target key start
LH: loop header
LB: loop body
LE: loop exit
PB: predicated region body
PF: predicated region fallthrough
CT: control target
= control target key end

     0   :  { %s1302_s0 = inlined_call_operand.vmem [shape: s32[2], index: 0, kind: input, shape index: {}]   ;;  %s1303_s1 = inlined_call_operand.hbm [shape: f32[2,8,32], index: 1, kind: input, shape index: {}]   ;;  %s1304_s2 = inlined_call_operand.hbm [shape: f32[2,8,32], index: 2, kind: input, shape index: {}]   ;;  %s1305_s3 = inlined_call_operand.hbm [shape: f32[2,8,32], index: 3, kind: input, shape index: {}]   ;;  %s1306_s4 = inlined_call_operand.hbm [shape: f32[2,8,32], index: 4, kind: output, shape index: {0}]   ;;  %s1307_s5 = inlined_call_operand.hbm [shape: f32[2,8,8], index: 5, kind: output, shape index: {1}]  }
   0x1   :  { %1311 = sst [smem:[#allocation21_spill]] %s1304_s2  ;;  %s11_s20 = sshll.u32 %s1302_s0, 4  ;;  %s12_s20 = int_to_ptr.vmem [resolvable:$true] %s11_s20 }
   0x2   :  { %s808_s21 = scalar_lea.vmem %s12_s20, 16  ;;  %p813_p1 = scmp.lt.s32.totalorder %s12_s20, %s12_s20 }
   0x3   :  { %p809_p0 = scmp.ne.s32.totalorder %s12_s20, %s808_s21  ;;  %p814_p2 = scmp.lt.s32.totalorder %s808_s21, %s808_s21 }
   0x5   :  { %p815_p3 = por %p814_p2, %p813_p1 }
   0x7   :  { %p816_p4 = pnand %p815_p3, %p809_p0 }
   0x9   :  { %819 = shalt.err (!%p816_p4)  }
   0xa   :  { %s1022_s22 = smov [#allocation3]  }
   0xb   :  { %14 = dma.vmem_to_smem %s12_s20, 16, %s1022_s22, [#allocation2] }
   0xc   :  { %980 = dma.done.wait [#allocation2], 16 }
   0xd   :  { %981 = vsyncadd [#allocation2], 4294967280 }
   0xe   :  { %16 = sfence }
   0xf   :  { %17 = vsyncpa [#allocation5], 0 }
  0x10   :  { %19 = vsyncpa [#allocation5 + $0x1], 0 }
  0x11   :  { %20 = vsyncpa [#allocation8], 0 }
  0x12   :  { %22 = vsyncpa [#allocation8 + $0x1], 0 }
  0x13   :  { %23 = vsyncpa [#allocation6], 0 }
  0x14   :  { %25 = vsyncpa [#allocation6 + $0x1], 0 }
  0x15   :  { %26 = vsyncpa [#allocation12], 0 }
  0x16   :  { %28 = vsyncpa [#allocation12 + $0x1], 0  ;;  %s1063_s0 = smov 0   ;;  %s1065_s23 = smov 0  }
  0x17   :  { %s1067_s24 = smov 0   ;;  %s1069_s25 = smov 0  }
  0x18   :  { %s1071_s26 = smov 0   ;;  %s1073_s27 = smov 0  }
  0x19 LB: > { %1312 = sst [smem:[#allocation18_spill]] %s1016_s26  ;;  %s1094_s28 = sadd.s32 4294967295, %s1020_s27   ;;  %s1020_s27 = sphi %s1073_s27, %s34_s27   ;;  %s1016_s26 = sphi %s1071_s26, %s1326_s26   ;;  %s1012_s25 = sphi %s1069_s25, %s1325_s25   ;;  %s1008_s24 = sphi %s1067_s24, %s1329_s24   ;;  %s1004_s23 = sphi %s1065_s23, %s1328_s23   ;;  %s1000_s0 = sphi %s1063_s0, %s1327_s0  }
  0x1a   : > { %s686_s29 = sadd.s32 4294967294, %s1020_s27   ;;  %s46_s30 = sadd.s32 1, %s1016_s26 }
  0x1b   : > { %s55_s6 = sadd.s32 1, %s1008_s24  ;;  %p48_p5 = scmp.ge.s32.totalorder %s46_s30, 2 }
  0x1c   : > { %p62_p6 = scmp.ne.s32.totalorder %s1008_s24, %s1004_s23  ;;  %p63_p7 = scmp.eq.s32.totalorder %s1020_s27, 0 }
  0x1d   : > { %p68_p8 = scmp.ne.s32.totalorder %s1004_s23, %s1000_s0  ;;  %s1331_s30 = smov (%p48_p5, %s46_s30), 0 }
  0x1e   : > { %1313 = sst [smem:[#allocation19_spill]] %s1331_s30  ;;  %p1106_p9 = por %p63_p7, %p62_p6 }
  0x1f   : > { %p69_p10 = scmp.eq.s32.totalorder %s1094_s28, 0  ;;  %s50_s8 = ssub.s32 %s1016_s26, %s1331_s30 }
  0x20   : > { %p146_p11 = scmp.eq.s32.totalorder %s1094_s28, 1  ;;  %p53_p12 = scmp.eq.s32.totalorder %s50_s8, 0 }
  0x21   : > { %p1114_p13 = por %p69_p10, %p68_p8  ;;  %p152_p1 = scmp.eq.s32.totalorder %s686_s29, 1 }
  0x22   : > { %p1118_p0 = por %p146_p11, %p62_p6  ;;  %p751_p4 = scmp.lt.s32.totalorder %s1020_s27, 2 }
  0x23   : > { %s1123_s11 = scalar_select %p53_p12, %s1008_s24, %s55_s6  }
  0x24   : > { %p1125_p2 = por %p152_p1, %p68_p8  ;;  %s1308_s13 = sand.u32 1, %s1008_s24  }
  0x25   : > { %1317 = sst [smem:[#allocation20_spill]] %s1123_s11  ;;  %s1134_s14 = sshll.u32 %s1308_s13, 3 }
  0x26   : > { %s1137_s15 = sshll.u32 %s1016_s26, 7  ;;  %p1141_p5 = pnand %p751_p4, %p1106_p9 }
  0x27   : > { %s219_s17 = sand.u32 1, %s1020_s27   ;;  %s1320_s2 = sld [smem:[#allocation21_spill]] }
  0x28   : > { %s223_s21 = scalar_lea.vmem [#allocation7], %s1134_s14  ;;  %p695_p6 = scmp.ge.s32.totalorder %s1020_s27, 1 }
  0x29   : > { %s230_s22 = sshll.u32 %s223_s21, 4  ;;  %p253_p7 = scmp.lt.s32.totalorder %s1020_s27, 3  ;;  %s231_s22 = int_to_ptr.vmem [resolvable:$true] %s230_s22 }
  0x2a   : > { %s1153_s29 = scalar_lea.sflag [#allocation8], %s219_s17  ;;  %p822_p8 = pneg %p1141_p5 }
  0x2b   : > { %s833_s6 = scalar_lea.vmem %s231_s22, 128  ;;  %s1023_s7 = smov [#allocation7]  }
  0x2c   : > { %p834_p9 = scmp.ne.s32.totalorder %s231_s22, %s833_s6  ;;  %s838_s8 = sshll.u32 %s1023_s7, 4  ;;  %s839_s8 = int_to_ptr.vmem [resolvable:$false] %s838_s8 }
  0x2d   : > { %s228_s20 = scalar_lea.hbm %s1320_s2, %s1137_s15  ;;  %s840_s18 = scalar_lea.vmem %s839_s8, 256 }
  0x2e   : > { %p836_p10 = pnand %p834_p9, %p822_p8  ;;  %p841_p12 = scmp.lt.s32.totalorder %s231_s22, %s839_s8 }
  0x2f   : > { %p842_p1 = scmp.lt.s32.totalorder %s840_s18, %s833_s6 }
  0x30   : > { %p837_p11 = pneg %p836_p10 }
  0x31   : > { %p843_p4 = por %p842_p1, %p841_p12 }
  0x33   : > { %p844_p3 = pnand %p843_p4, %p837_p11 }
  0x35   : > { %847 = shalt.err (!%p844_p3)
}
  0x36   : > { %740 = dma.hbm_to_vmem [thread:$0]  (!%p1141_p5), %s228_s20, 128, %s231_s22, %s1153_s29  }
  0x37   : > { %p1167_p9 = pnand %p695_p6, %p253_p7  ;;  %s210_s6 = scalar_lea.hbm %s1303_s1, %s1137_s15 }
  0x38   : > { %s204_s7 = scalar_lea.vmem [#allocation4], %s1134_s14  ;;  %s246_s2 = scalar_lea.hbm %s1305_s3, %s1137_s15 }
  0x39   : > { %s212_s8 = sshll.u32 %s204_s7, 4  ;;  %s1322_s30 = sand.u32 1, %s1008_s24   ;;  %s213_s8 = int_to_ptr.vmem [resolvable:$true] %s212_s8 }
  0x3a   : > { %s201_s26 = scalar_lea.sflag [#allocation5], %s1322_s30  ;;  %s861_s20 = scalar_lea.vmem %s213_s8, 128 }
  0x3b   : > { %p862_p3 = scmp.ne.s32.totalorder %s213_s8, %s861_s20  ;;  %s1024_s22 = smov [#allocation4]  }
  0x3c   : > { %s866_s11 = sshll.u32 %s1024_s22, 4  ;;  %s867_s11 = int_to_ptr.vmem [resolvable:$false] %s866_s11 }
  0x3d   : > { %p864_p6 = pnand %p862_p3, %p822_p8  ;;  %s868_s19 = scalar_lea.vmem %s867_s11, 256 }
  0x3e   : > { %p869_p10 = scmp.lt.s32.totalorder %s213_s8, %s867_s11  ;;  %p870_p11 = scmp.lt.s32.totalorder %s868_s19, %s861_s20 }
  0x3f   : > { %p865_p7 = pneg %p864_p6 }
  0x40   : > { %p871_p12 = por %p870_p11, %p869_p10 }
  0x42   : > { %p872_p1 = pnand %p871_p12, %p865_p7 }
  0x44   : > { %875 = shalt.err (!%p872_p1)
}
  0x45   : > { %737 = dma.hbm_to_vmem [thread:$0]  (!%p1141_p5), %s210_s6, 128, %s213_s8, %s201_s26  }
  0x46   : > { %s241_s30 = scalar_lea.vmem [#allocation9], %s1134_s14  ;;  %s1025_s7 = smov [#allocation9]  }
  0x47   : > { %s248_s13 = sshll.u32 %s241_s30, 4  ;;  %s894_s11 = sshll.u32 %s1025_s7, 4  ;;  %s249_s13 = int_to_ptr.vmem [resolvable:$true] %s248_s13  ;;  %s895_s11 = int_to_ptr.vmem [resolvable:$false] %s894_s11 }
  0x48   : > { %s889_s21 = scalar_lea.vmem %s249_s13, 128  ;;  %s896_s18 = scalar_lea.vmem %s895_s11, 256 }
  0x49   : > { %p890_p4 = scmp.ne.s32.totalorder %s249_s13, %s889_s21  ;;  %p897_p7 = scmp.lt.s32.totalorder %s249_s13, %s895_s11 }
  0x4a   : > { %p898_p10 = scmp.lt.s32.totalorder %s896_s18, %s889_s21 }
  0x4b   : > { %p892_p3 = pnand %p890_p4, %p822_p8 }
  0x4c   : > { %p899_p11 = por %p898_p10, %p897_p7 }
  0x4d   : > { %p893_p6 = pneg %p892_p3 }
  0x4f   : > { %p900_p12 = pnand %p899_p11, %p893_p6 }
  0x51   : > { %903 = shalt.err (!%p900_p12)
}
  0x52   : > { %743 = dma.hbm_to_vmem [thread:$0]  (!%p1141_p5), %s246_s2, 128, %s249_s13, %s1153_s29  }
  0x53   : > { %257 = sbr.rel (%p1167_p9) target bundleno = 811 (0x32b), region = 32  ;;  %s1202_s6 = sand.u32 (!%p1167_p9), 1, %s1004_s23  }
  0x54   : > { %s1205_s8 = sshll.u32 (!%p1167_p9), %s1202_s6, 3  ;;  %s260_s16 = scalar_lea.sflag (!%p1167_p9), [#allocation5], %s1202_s6 }
  0x55   : > { %s263_s20 = scalar_lea.vmem (!%p1167_p9), [#allocation4], %s1205_s8 }
  0x58   : > { %983 = dma.done.wait (%p1114_p13), %s260_s16, 128  }
  0x59   : > { %985 = vsyncadd (%p1114_p13), %s260_s16, 4294967168  ;;  %s268_s2 = sand.u32 1, %s1094_s28   ;;  %s272_s29 = scalar_lea.vmem [#allocation7], %s1205_s8 }
  0x5a   : > { %s269_s15 = scalar_lea.sflag [#allocation8], %s268_s2 }
  0x5b   : > { %987 = dma.done.wait (%p1114_p13), %s269_s15, 256  }
  0x5c   : > { %989 = vsyncadd (%p1114_p13), %s269_s15, 4294967040  ;;  %v1026_v0 = vmov 0.0   ;;  %vm1027_vm0 = vmmov 0   ;;  %vm325_vm1 = vcmask 261120   ;;  %v322_v1 = vld [vmem:[%s272_s29] sm:$0xff]  ;;  %v321_v2 = vld [vmem:[%s263_s20] sm:$0xff]  ;;  %v403_v4 = vlaneseq }
  0x5d   : > { %714 = vmatprep.subr.mxu0 %v1026_v0  ;;  %716 = vmatprep.mubr.msk.f32.mxu0 %vm1027_vm0, %v1026_v0  ;;  %v324_v3 = vmul.f32 0.17677669, %v321_v2  ;;  %s402_s28 = sld [smem:[#allocation3 + %s1012_s25]]  ;;  %vm408_vm3 = vcmask 64512   ;;  %s281_s9 = scalar_lea.vmem [#allocation9], %s1205_s8 }
  0x5e   : > { %719 = vmatprep.subr.mxu1 %v1026_v0  ;;  %721 = vmatprep.mubr.msk.f32.mxu1 %vm1027_vm0, %v1026_v0  ;;  %v404_v5 = vand.u32 127, %v403_v4  ;;  %v323_v16 = vld [vmem:[%s281_s9] sm:$0xff]  ;;  %s320_s17 = scalar_lea.vmem [#allocation11], %s1205_s8  ;;  %s706_s22 = sshll.u32 %s1012_s25, 7 }
  0x5f   : > { %715 = vmatpush3.xpose.msk.msra.mxu0 %vm325_vm1, %v322_v1  ;;  %720 = vmatpush3.msra.mxu1 %v323_v16  ;;  %s527_s13 = scalar_lea.hbm %s1307_s5, %s706_s22  ;;  %s529_s21 = sshll.u32 %s320_s17, 4  ;;  %s530_s21 = int_to_ptr.vmem [resolvable:$true] %s529_s21 }
  0x60   : > { %s501_s7 = scalar_lea.sflag [#allocation12], %s1202_s6  ;;  %s904_s11 = scalar_lea.vmem %s530_s21, 128 }
  0x61   : > { %p905_p13 = scmp.ne.s32.totalorder %s530_s21, %s904_s11  ;;  %s1028_s18 = smov [#allocation11]  }
  0x62   : > { %717 = vmatmul.mubr.msk.f32.vlgmr.msra.gmra.mxu0 %vm325_vm1, %v324_v3  ;;  %s908_s26 = sshll.u32 %s1028_s18, 4  ;;  %s909_s26 = int_to_ptr.vmem [resolvable:$false] %s908_s26 }
  0x63   : > { %v405_v6 = vstv %s402_s28  ;;  %p906_p5 = pnand %p905_p13, %p1118_p0  ;;  %s910_s14 = scalar_lea.vmem %s909_s26, 256 }
  0x64   : > { %vm406_vm2 = vcmp.lt.s32.totalorder %v404_v5, %v405_v6  ;;  %p911_p9 = scmp.lt.s32.totalorder %s530_s21, %s909_s26  ;;  %p912_p1 = scmp.lt.s32.totalorder %s910_s14, %s904_s11 }
  0x65   : > { %p907_p8 = pneg %p906_p5 }
  0x66   : > { %p913_p4 = por %p912_p1, %p911_p9 }
  0x68   : > { %p914_p3 = pnand %p913_p4, %p907_p8 }
 0x122   : > { %v398_v7 = vpop.f32.mrf.mxu0 }
 0x123   : > { %v407_v8 = vsel %vm406_vm2, %v398_v7, -1000000.0 }
 0x124   : > { %v718_v9 = vpop.f32.mrf.mxu0  ;;  %v409_v10 = vsel %vm408_vm3, %v407_v8, -inf }
 0x125   : > { %410 = vmax.xlane.f32.xlu0 %v409_v10 }
 0x1ae   : > { %v411_v11 = vpop.xlane.xlu0 %410 }
 0x1af   : > { %v412_v12 = vsub.f32 %v407_v8, %v411_v11 }
 0x1b1   : > { %v413_v13 = vmul.f32 1.442695, %v412_v12 }
 0x1b3   : > { %804 = vpow2.f32 %v413_v13 }
 0x1c0   : > { %v805_v14 = vpop.eup %804 }
 0x1c1   : > { %v415_v15 = vsel %vm408_vm3, %v805_v14, 0.0 }
 0x1c2   : > { %416 = vadd.xlane.f32.xlu0 %v415_v15 }
 0x24b   : > { %v417_v17 = vpop.xlane.xlu0 %416 }
 0x24c   : > { %806 = vrcp.f32 %v417_v17 }
 0x259   : > { %v807_v18 = vpop.eup %806 }
 0x25a   : > { %v419_v19 = vmul.f32 %v807_v18, %v805_v14 }
 0x25c   : > { %722 = vmatmul.mubr.msk.f32.vlgmr.msra.gmra.mxu1 %vm408_vm3, %v419_v19  ;;  %420 = vst.msk [vmem:[%s320_s17] sm:$0xff] %vm408_vm3, %v419_v19 }
 0x25d   : > { %917 = shalt.err (!%p914_p3)
}
 0x25e   : > { %s918_s16 = scalar_lea.hbm %s527_s13, 128  ;;  %s922_s15 = scalar_lea.hbm %s1307_s5, 256 }
 0x25f   : > { %p919_p6 = scmp.ne.s32.totalorder %s527_s13, %s918_s16  ;;  %p923_p11 = scmp.lt.s32.totalorder %s527_s13, %s1307_s5 }
 0x260   : > { %p924_p12 = scmp.lt.s32.totalorder %s922_s15, %s918_s16 }
 0x261   : > { %p920_p7 = pnand %p919_p6, %p1118_p0 }
 0x262   : > { %p925_p13 = por %p924_p12, %p923_p11 }
 0x263   : > { %p921_p10 = pneg %p920_p7 }
 0x265   : > { %p926_p5 = pnand %p925_p13, %p921_p10 }
 0x267   : > { %929 = shalt.err (!%p926_p5)
}
 0x268   : > { %731 = dma.vmem_to_hbm [thread:$0]  (%p1118_p0), %s530_s21, 128, %s527_s13, %s501_s7  }
 0x269   : > { %s313_s9 = scalar_lea.vmem [#allocation10], %s1205_s8  ;;  %s1253_s11 = scalar_lea.hbm %s1306_s4, %s706_s22 }
 0x26a   : > { %s515_s17 = sshll.u32 %s313_s9, 4  ;;  %s496_s18 = scalar_lea.sflag [#allocation6], %s1202_s6  ;;  %s1255_s17 = int_to_ptr.vmem [resolvable:$true] %s515_s17 }
 0x26b   : > { %s930_s26 = scalar_lea.vmem %s1255_s17, 128  ;;  %s1029_s25 = smov [#allocation10]  }
 0x26c   : > { %p931_p8 = scmp.ne.s32.totalorder %s1255_s17, %s930_s26  ;;  %s934_s8 = sshll.u32 %s1029_s25, 4  ;;  %s935_s8 = int_to_ptr.vmem [resolvable:$false] %s934_s8 }
 0x26d   : > { %s936_s22 = scalar_lea.vmem %s935_s8, 256  ;;  %p937_p4 = scmp.lt.s32.totalorder %s1255_s17, %s935_s8 }
 0x26e   : > { %p932_p9 = pnand %p931_p8, %p1118_p0  ;;  %p938_p3 = scmp.lt.s32.totalorder %s936_s22, %s930_s26 }
 0x270   : > { %p933_p1 = pneg %p932_p9  ;;  %p939_p6 = por %p938_p3, %p937_p4 }
 0x272   : > { %p940_p7 = pnand %p939_p6, %p933_p1 }
 0x31c   : > { %v490_v20 = vpop.f32.mrf.mxu1 }
 0x31d   : > { %494 = vst.msk [vmem:[%s313_s9] sm:$0xff] %vm325_vm1, %v490_v20 }
 0x31e   : > { %v723_v21 = vpop.f32.mrf.mxu1 }
 0x31f   : > { %943 = shalt.err (!%p940_p7)
}
 0x320   : > { %s944_s13 = scalar_lea.hbm %s1253_s11, 128  ;;  %s948_s7 = scalar_lea.hbm %s1306_s4, 256 }
 0x321   : > { %p945_p10 = scmp.ne.s32.totalorder %s1253_s11, %s944_s13  ;;  %p949_p13 = scmp.lt.s32.totalorder %s1253_s11, %s1306_s4 }
 0x322   : > { %p950_p5 = scmp.lt.s32.totalorder %s948_s7, %s944_s13 }
 0x323   : > { %p946_p11 = pnand %p945_p10, %p1118_p0 }
 0x324   : > { %p951_p8 = por %p950_p5, %p949_p13 }
 0x325   : > { %p947_p12 = pneg %p946_p11 }
 0x327   : > { %p952_p9 = pnand %p951_p8, %p947_p12 }
 0x329   : > { %955 = shalt.err (!%p952_p9)
}
 0x32a   : > { %730 = dma.vmem_to_hbm [thread:$0]  (%p1118_p0), %s1255_s17, 128, %s1253_s11, %s496_s18  }
 0x32b PF: > { %s541_s20 = sand.u32 1, %s1000_s0   ;;  %p1323_p1 = scmp.ge.s32.totalorder %s1020_s27, 2 }
 0x32c   : > { %s542_s2 = scalar_lea.sflag [#allocation6], %s541_s20 }
 0x32d   : > { %p745_p4 = pnand %p1323_p1, %p1125_p2 }
 0x32f   : > { %p746_p3 = pneg %p745_p4 }
 0x331   : > { %991 = dma.done.wait (%p746_p3), %s542_s2, 128  }
 0x332   : > { %993 = vsyncadd (%p746_p3), %s542_s2, 4294967168  ;;  %s551_s15 = scalar_lea.sflag [#allocation12], %s541_s20 }
 0x333   : > { %995 = dma.done.wait (%p746_p3), %s551_s15, 128  }
 0x334   : > { %997 = vsyncadd (%p746_p3), %s551_s15, 4294967168  ;;  %s34_s27 = sadd.s32 1, %s1020_s27   ;;  %s1324_s10 = sld [smem:[#allocation20_spill]] }
 0x335   : > { %p31_p6 = scmp.ge.s32.totalorder %s34_s27, 4   ;;  %s1325_s25 = sld [smem:[#allocation18_spill]] }
 0x336   : > { %s1326_s26 = sld [smem:[#allocation19_spill]]  ;;  %s1327_s0 = smov %s1004_s23 }
 0x337   : > { %s1328_s23 = smov %s1008_s24  ;;  %33 = sbr.rel (!%p31_p6) target bundleno = 25 (0x19), region = 118 }
 0x33a   : > { %s1329_s24 = smov %s1324_s10 }
 0x33c   :  { %556 = vsyncpa [#allocation5], 1 }
 0x33d   :  { %558 = vsyncpa [#allocation5 + $0x1], 1 }
 0x33e   :  { %559 = vsyncpa [#allocation8], 1 }
 0x33f   :  { %561 = vsyncpa [#allocation8 + $0x1], 1 }
 0x340   :  { %562 = vsyncpa [#allocation6], 1 }
 0x341   :  { %564 = vsyncpa [#allocation6 + $0x1], 1 }
 0x342   :  { %565 = vsyncpa [#allocation12], 1 }
 0x343   :  { %567 = vsyncpa [#allocation12 + $0x1], 1 }

</bundles_post_ra>
